<compile_context>
chip_gen: v7x
topology: tpu7x:2x2x1
jax: 0.10.0
libtpu: 0.0.40
codegen_flags: <defaults>
</compile_context>

<pallas_src>
import jax
import jax.numpy as jnp
from jax.experimental import pallas as pl
from jax.experimental.pallas import tpu as pltpu


def _fused_split_cat_kernel(x_ref, wt_ref, b_ref, o_ref):
    """One grid step: (C, T) pixel-column tile -> (2*Co, T) output tile.

    x_ref : (C, T)      input channels x spatial tile (lane-dense)
    wt_ref: (2*Co, C)   concatenated [W_a; W_b], already transposed (resident)
    b_ref : (2*Co, 1)   concatenated bias (resident)
    o_ref : (2*Co, T)   cat([relu(conv_a), relu(conv_b)], channel dim)
    """
    y = jnp.dot(wt_ref[...], x_ref[...], preferred_element_type=jnp.float32)
    y = jnp.maximum(y + b_ref[...], 0.0)
    o_ref[...] = y.astype(o_ref.dtype)          # single unmasked lane-dense store


def _pick_tile(hw_aligned, c_in, c_out, *, max_tile=4096,
               tile_budget_bytes=6 * 1024 * 1024):
    """Largest 128-aligned spatial tile whose double-buffered in+out tiles fit
    a conservative per-tile VMEM budget (safe on v7x's 64 MiB VMEM)."""
    per_col_bytes = 2 * (c_in + c_out) * 4          # 2 buffers, f32 in + out
    fit = (tile_budget_bytes // max(per_col_bytes, 1)) // 128 * 128
    return int(max(128, min(hw_aligned, max_tile, fit)))


def sequential_split_cat(x, wa, ba, wb, bb):
    """x: (B, C, H, W) f32.  wa/wb: (C, Co).  ba/bb: (1, Co).

    Returns (B, 2*Co, H, W) == cat([relu(conv1x1_a(x)), relu(conv1x1_b(x))], dim=1).
    """
    B, C, H, W = x.shape
    Co = wa.shape[1]
    Cout = 2 * Co
    HW = H * W

    # --- fuse the two segments once in the wrapper (grid-invariant params) ---
    w_cat_t = jnp.concatenate([wa, wb], axis=1).T.astype(jnp.float32)   # (2*Co, C)
    b_cat = jnp.concatenate([ba, bb], axis=1).reshape(Cout, 1).astype(jnp.float32)

    # --- lane-aligned spatial tiling; pad H*W if needed (no transposes) -----
    hw_aligned = pl.cdiv(HW, 128) * 128
    tile = _pick_tile(hw_aligned, C, Cout)
    hw_pad = pl.cdiv(hw_aligned, tile) * tile

    x3 = x.reshape(B, C, HW).astype(jnp.float32)
    if hw_pad != HW:
        x3 = jnp.pad(x3, ((0, 0), (0, 0), (0, hw_pad - HW)))

    grid = (B, hw_pad // tile)

    # --- explicit VMEM budget: double-buffered tiles + resident weights -----
    itemsize = 4
    needed = (2 * (C * tile + Cout * tile) + (Cout * C + Cout)) * itemsize
    vmem_limit = int(min(max(needed * 2, 32 * 1024 * 1024), 48 * 1024 * 1024))

    out3 = pl.pallas_call(
        _fused_split_cat_kernel,
        out_shape=jax.ShapeDtypeStruct((B, Cout, hw_pad), jnp.float32),
        grid_spec=pltpu.PrefetchScalarGridSpec(
            num_scalar_prefetch=0,
            grid=grid,
            in_specs=[
                # (B, C, HWp): batch squeezed, full channel dim, lane-dense HW tile
                pl.BlockSpec((None, C, tile), lambda b, t: (b, 0, t)),
                # resident fused weight / bias (constant index_map -> stays in VMEM)
                pl.BlockSpec((Cout, C), lambda b, t: (0, 0)),
                pl.BlockSpec((Cout, 1), lambda b, t: (0, 0)),
            ],
            out_specs=pl.BlockSpec((None, Cout, tile), lambda b, t: (b, 0, t)),
        ),
        compiler_params=pltpu.CompilerParams(
            dimension_semantics=("parallel", "parallel"),
            vmem_limit_bytes=vmem_limit,
        ),
    )(x3, w_cat_t, b_cat)

    # Already NCHW: drop spatial padding (if any) and restore H, W.
    if hw_pad != HW:
        out3 = out3[:, :, :HW]
    return out3.reshape(B, Cout, H, W)


def _reference(x, wa, ba, wb, bb):
    """Pure-JAX reference of the PyTorch forward (cat of two conv1x1+ReLU)."""
    B, C, H, W = x.shape
    x2d = jnp.transpose(x, (0, 2, 3, 1)).reshape(-1, C)
    ya = jnp.maximum(x2d @ wa + ba, 0.0)
    yb = jnp.maximum(x2d @ wb + bb, 0.0)
    y = jnp.concatenate([ya, yb], axis=-1)
    return y.reshape(B, H, W, -1).transpose(0, 3, 1, 2)


if __name__ == "__main__":
    B, C, H, W = 2, 4, 16, 16
    Co = 8  # output channels per segment -> final channels = 16

    key = jax.random.PRNGKey(0)
    kx, kwa, kba, kwb, kbb = jax.random.split(key, 5)

    x = jax.random.normal(kx, (B, C, H, W), dtype=jnp.float32)
    scale = 1.0 / jnp.sqrt(C)
    wa = jax.random.normal(kwa, (C, Co), dtype=jnp.float32) * scale
    ba = jax.random.normal(kba, (1, Co), dtype=jnp.float32) * 0.1
    wb = jax.random.normal(kwb, (C, Co), dtype=jnp.float32) * scale
    bb = jax.random.normal(kbb, (1, Co), dtype=jnp.float32) * 0.1

    out = sequential_split_cat(x, wa, ba, wb, bb)
    out = jax.block_until_ready(out)

    ref = _reference(x, wa, ba, wb, bb)
    assert out.shape == (B, 2 * Co, H, W), out.shape
    assert jnp.allclose(out, ref, atol=1e-5, rtol=1e-5), "mismatch vs reference"

    print("KERNEL_OK")
</pallas_src>

<mosaic_0001>
module attributes {stable_mosaic.version = 11 : i64} {
  func.func @_fused_split_cat_kernel(%arg0: i32, %arg1: i32, %arg2: memref<1x4x256xf32, #tpu.memory_space<vmem>>, %arg3: memref<16x4xf32, #tpu.memory_space<vmem>>, %arg4: memref<16x1xf32, #tpu.memory_space<vmem>>, %arg5: memref<1x16x256xf32, #tpu.memory_space<vmem>>) attributes {dimension_semantics = [#tpu.dimension_semantics<parallel>, #tpu.dimension_semantics<parallel>], iteration_bounds = array<i64: 2, 1>, scalar_prefetch = 0 : i64, scratch_operands = 0 : i64, tpu.core_type = #tpu.core_type<tc>, window_params = [{transform_indices = @transform_0, window_bounds = array<i64: 1, 4, 256>}, {pipeline_mode = #tpu.pipeline_mode<synchronous>, transform_indices = @transform_1, window_bounds = array<i64: 16, 4>}, {pipeline_mode = #tpu.pipeline_mode<synchronous>, transform_indices = @transform_2, window_bounds = array<i64: 16, 1>}, {transform_indices = @transform_3, window_bounds = array<i64: 1, 16, 256>}]} {
    %c0 = arith.constant 0 : index
    %c0_0 = arith.constant 0 : index
    %0 = vector.load %arg3[%c0, %c0_0] : memref<16x4xf32, #tpu.memory_space<vmem>>, vector<16x4xf32>
    %c0_1 = arith.constant 0 : index
    %c0_2 = arith.constant 0 : index
    %c0_3 = arith.constant 0 : index
    %1 = vector.load %arg2[%c0_1, %c0_2, %c0_3] : memref<1x4x256xf32, #tpu.memory_space<vmem>>, vector<1x4x256xf32>
    %2 = vector.shape_cast %1 : vector<1x4x256xf32> to vector<4x256xf32>
    %cst = arith.constant dense<0.000000e+00> : vector<16x256xf32>
    %3 = tpu.matmul %0, %2, %cst {dimension_numbers = #tpu.dot_dimension_numbers<[1], [0], [0], [1], [0, 0, 1, 1], [], []>} : vector<16x4xf32>, vector<4x256xf32>, vector<16x256xf32> -> vector<16x256xf32>
    %c0_4 = arith.constant 0 : index
    %c0_5 = arith.constant 0 : index
    %4 = vector.load %arg4[%c0_4, %c0_5] : memref<16x1xf32, #tpu.memory_space<vmem>>, vector<16x1xf32>
    %5 = vector.broadcast %4 : vector<16x1xf32> to vector<16x256xf32>
    %6 = arith.addf %3, %5 : vector<16x256xf32>
    %cst_6 = arith.constant 0.000000e+00 : f32
    %7 = vector.broadcast %cst_6 : f32 to vector<16x256xf32>
    %8 = arith.maximumf %6, %7 : vector<16x256xf32>
    %c0_7 = arith.constant 0 : index
    %c0_8 = arith.constant 0 : index
    %c0_9 = arith.constant 0 : index
    %9 = vector.load %arg5[%c0_7, %c0_8, %c0_9] : memref<1x16x256xf32, #tpu.memory_space<vmem>>, vector<1x16x256xf32>
    %10 = vector.shape_cast %9 : vector<1x16x256xf32> to vector<16x256xf32>
    %11 = vector.shape_cast %8 : vector<16x256xf32> to vector<1x16x256xf32>
    tpu.vector_store %arg5[%c0_7, %c0_8, %c0_9], %11 {strides = array<i32>} : memref<1x16x256xf32, #tpu.memory_space<vmem>>, vector<1x16x256xf32>,
    return
  }
  func.func @transform_0(%arg0: i32, %arg1: i32) -> (i32, i32, i32) {
    %c0_i32 = arith.constant 0 : i32
    %c0_i32_0 = arith.constant 0 : i32
    return %arg0, %c0_i32, %arg1 : i32, i32, i32
  }
  func.func @transform_1(%arg0: i32, %arg1: i32) -> (i32, i32) {
    %c0_i32 = arith.constant 0 : i32
    %c0_i32_0 = arith.constant 0 : i32
    %c0_i32_1 = arith.constant 0 : i32
    return %c0_i32, %c0_i32_0 : i32, i32
  }
  func.func @transform_2(%arg0: i32, %arg1: i32) -> (i32, i32) {
    %c0_i32 = arith.constant 0 : i32
    %c0_i32_0 = arith.constant 0 : i32
    %c0_i32_1 = arith.constant 0 : i32
    return %c0_i32, %c0_i32_0 : i32, i32
  }
  func.func @transform_3(%arg0: i32, %arg1: i32) -> (i32, i32, i32) {
    %c0_i32 = arith.constant 0 : i32
    %c0_i32_0 = arith.constant 0 : i32
    return %arg0, %c0_i32, %arg1 : i32, i32, i32
  }
}

</mosaic_0001>

<bundles_post_ra>
// kernel: tpu_custom_call.1
= control target key start
LH: loop header
LB: loop body
LE: loop exit
PB: predicated region body
PF: predicated region fallthrough
CT: control target
= control target key end

     0   :  { %8 = vsyncpa [#allocation3], 0  ;;  %s723_s0 = inlined_call_operand.vmem [shape: f32[2,4,256], index: 0, kind: input, shape index: {}]   ;;  %s724_s1 = inlined_call_operand.vmem [shape: f32[16,4], index: 1, kind: input, shape index: {}]   ;;  %s725_s2 = inlined_call_operand.vmem [shape: f32[16,1], index: 2, kind: input, shape index: {}]   ;;  %s726_s3 = inlined_call_operand.hbm [shape: f32[2,16,256], index: 3, kind: output, shape index: {}]  }
   0x1   :  { %10 = vsyncpa [#allocation3 + $0x1], 0  ;;  %s596_s12 = smov 0   ;;  %s598_s13 = smov 0  }
   0x2   :  { %s600_s14 = smov 0   ;;  %s602_s15 = smov 0  }
   0x3   :  { %s604_s16 = smov 0   ;;  %s606_s17 = smov 0  }
   0x4 LB: > { %s409_s18 = sadd.s32 4294967295, %s569_s17   ;;  %s410_s19 = sadd.s32 4294967294, %s569_s17   ;;  %s569_s17 = sphi %s606_s17, %s16_s17   ;;  %s565_s16 = sphi %s604_s16, %s733_s16   ;;  %s561_s15 = sphi %s602_s15, %s732_s15   ;;  %s557_s14 = sphi %s600_s14, %s731_s14   ;;  %s553_s13 = sphi %s598_s13, %s730_s13   ;;  %s549_s12 = sphi %s596_s12, %s729_s12  }
   0x5   : > { %s28_s20 = sadd.s32 1, %s565_s16  ;;  %s107_s21 = sadd.s32 1, %s557_s14 }
   0x6   : > { %p30_p0 = scmp.ge.s32.totalorder %s28_s20, 2  ;;  %p117_p1 = scmp.ne.s32.totalorder %s557_s14, %s553_s13 }
   0x7   : > { %p118_p2 = scmp.eq.s32.totalorder %s409_s18, 1  ;;  %p123_p3 = scmp.ne.s32.totalorder %s553_s13, %s549_s12 }
   0x8   : > { %s735_s20 = smov (%p30_p0, %s28_s20), 0  ;;  %p124_p5 = scmp.eq.s32.totalorder %s410_s19, 1 }
   0x9   : > { %p636_p4 = por %p118_p2, %p117_p1  ;;  %s102_s23 = ssub.s32 %s565_s16, %s735_s20 }
   0xa   : > { %p413_p6 = scmp.ge.s32.totalorder %s569_s17, 1  ;;  %p105_p7 = scmp.eq.s32.totalorder %s102_s23, 0 }
   0xb   : > { %p643_p8 = por %p124_p5, %p123_p3  ;;  %p161_p9 = scmp.lt.s32.totalorder %s569_s17, 3 }
   0xc   : > { %s649_s25 = scalar_select %p105_p7, %s557_s14, %s107_s21  }
   0xd   : > { %p162_p10 = pnand %p413_p6, %p161_p9 }
   0xe   : > { %p190_p11 = scmp.lt.s32.totalorder (!%p162_p10), %s561_s15, 1  ;;  %v571_v0 = vmov (!%p162_p10), 0.0   ;;  %v203_v1 = vld [vmem:[%s725_s2] sm:$0xff] (!%p162_p10)  ;;  %v572_v2 = vmov (!%p162_p10), 0   ;;  %v204_v3 = vld [vmem:[%s725_s2 + $0x8] sm:$0xff] (!%p162_p10)  ;;  %vm224_vm0 = vcmask (!%p162_p10), 1043456  }
   0xf   : > { %165 = sbr.rel (%p162_p10) target bundleno = 263 (0x107), region = 32  ;;  %293 = vmatprep.mubr.f32.mxu0 (!%p162_p10), %v571_v0  ;;  %299 = vmatprep.mubr.f32.mxu1 (!%p162_p10), %v571_v0  ;;  %v200_v6 = vld [vmem:[%s724_s1] sm:$0xff] (!%p162_p10)  ;;  %vm217_vm1 = vcmask (!%p162_p10), 31744   ;;  %v201_v7 = vld [vmem:[%s724_s1 + $0x8] sm:$0xff] (!%p162_p10)  ;;  %s186_s18 = sand.u32 (!%p162_p10), 1, %s553_s13  }
  0x10   : > { %489 = vset.pattern.permute.xlu0 (!%p162_p10), %v572_v2  ;;  %s414_s19 = sshll.u32 (!%p162_p10), %s186_s18, 5  ;;  %s427_s26 = sshll.u32 (!%p162_p10), %s561_s15, 9 }
  0x11   : > { %207 = vperm.xlu0 (!%p162_p10), %489, %v203_v1   ;;  %s188_s21 = scalar_lea.vmem (!%p162_p10), [#allocation2], %s414_s19  ;;  %s573_s4 = smov (!%p162_p10), [#allocation2]  }
  0x12   : > { %s330_s23 = sshll.u32 (!%p162_p10), %s188_s21, 4  ;;  %s495_s5 = sshll.u32 (!%p162_p10), %s573_s4, 4  ;;  %s670_s23 = int_to_ptr.vmem [resolvable:$true] %s330_s23  ;;  %s496_s5 = int_to_ptr.vmem [resolvable:$false] %s495_s5 }
  0x13   : > { %s491_s30 = scalar_lea.vmem (!%p162_p10), %s670_s23, 512  ;;  %s497_s6 = scalar_lea.vmem (!%p162_p10), %s496_s5, 1024 }
  0x14   : > { %p492_p12 = scmp.ne.s32.totalorder (!%p162_p10), %s670_s23, %s491_s30  ;;  %p498_p1 = scmp.lt.s32.totalorder (!%p162_p10), %s670_s23, %s496_s5 }
  0x15   : > { %212 = vperm.xlu0 (!%p162_p10), %489, %v204_v3   ;;  %p499_p2 = scmp.lt.s32.totalorder (!%p162_p10), %s497_s6, %s491_s30 }
  0x16   : > { %s191_s28 = scalar_select %p190_p11, %s561_s15, 1 }
  0x17   : > { %s677_s15 = scalar_lea.sflag [#allocation3], %s186_s18  ;;  %p493_p13 = pnand %p492_p12, %p636_p4 }
  0x18   : > { %s426_s29 = sshll.u32 %s191_s28, 3  ;;  %p500_p3 = por %p499_p2, %p498_p1 }
  0x19   : > { %s197_s7 = scalar_lea.vmem %s723_s0, %s426_s29  ;;  %s675_s29 = scalar_lea.hbm %s726_s3, %s427_s26 }
  0x1a   : > { %v202_v4 = vld [vmem:[%s197_s7] sm:$0xff]  ;;  %p494_p0 = pneg %p493_p13 }
  0x1b   : > { %v216_v5 = vcombine.high %v202_v4, %v202_v4 }
  0x1c   : > { %p501_p5 = pnand %p500_p3, %p494_p0 }
  0x1d   : > { %417 = vmatprep.subr.msk.mxu0 %vm224_vm0, %v216_v5  ;;  %428 = vmatprep.subr.msk.mxu1 %vm224_vm0, %v216_v5 }
  0x1e   : > { %418 = vmatpush1.msk.msra.mxu0 %vm224_vm0, %v202_v4  ;;  %429 = vmatpush1.msk.msra.mxu1 %vm224_vm0, %v202_v4 }
  0x1f   : > { %419 = vmatmul.mubr.msk.f32.vlgmr.msra.gmra.mrb[0].mxu0 %vm217_vm1, %v200_v6  ;;  %420 = vmatmul.mubr.msk.f32.vlgmr.msra.gmra.mrb[0].mxu1 %vm217_vm1, %v201_v7 }
  0x90   : > { %v208_v8 = vpop.permute.xlu0 %207 }
  0x94   : > { %v213_v9 = vpop.permute.xlu0 %212 }
  0xf2   : > { %v295_v10 = vpop.f32.mrb[0].mxu0  ;;  %v301_v11 = vpop.f32.mrb[0].mxu1 }
  0xf3   : > { %v296_v12 = vadd.f32 %v295_v10, %v208_v8  ;;  %v302_v13 = vadd.f32 %v301_v11, %v213_v9  ;;  %v297_v14 = vpop.f32.mrb[1].mxu0  ;;  %v303_v15 = vpop.f32.mrb[1].mxu1 }
  0xf4   : > { %v298_v16 = vadd.f32 %v297_v14, %v208_v8  ;;  %v304_v17 = vadd.f32 %v303_v15, %v213_v9 }
  0xf5   : > { %v306_v18 = vmax.f32 %v296_v12, 0.0  ;;  %v308_v19 = vmax.f32 %v302_v13, 0.0 }
  0xf6   : > { %v307_v20 = vmax.f32 %v298_v16, 0.0  ;;  %v309_v21 = vmax.f32 %v304_v17, 0.0 }
  0xf7   : > { %310 = vst [vmem:[%s188_s21] sm:$0xff] %v306_v18  ;;  %312 = vst [vmem:[%s188_s21 + $0x10] sm:$0xff] %v308_v19 }
  0xf8   : > { %311 = vst [vmem:[%s188_s21 + $0x8] sm:$0xff] %v307_v20  ;;  %313 = vst [vmem:[%s188_s21 + $0x18] sm:$0xff] %v309_v21 }
  0xf9   : > { %504 = shalt.err (!%p501_p5)
}
  0xfa   : > { %s505_s7 = scalar_lea.hbm %s675_s29, 512  ;;  %s509_s10 = scalar_lea.hbm %s726_s3, 1024 }
  0xfb   : > { %p506_p6 = scmp.ne.s32.totalorder %s675_s29, %s505_s7  ;;  %p510_p10 = scmp.lt.u32.totalorder %s675_s29, %s726_s3 }
  0xfc   : > { %p511_p11 = scmp.lt.u32.totalorder %s509_s10, %s505_s7  ;;  %p513_p13 = scmp.lt.u32.totalorder %s505_s7, %s675_s29 }
  0xfd   : > { %p507_p7 = pnand %p506_p6, %p636_p4 }
  0xfe   : > { %p512_p12 = por %p511_p11, %p510_p10 }
  0xff   : > { %p508_p9 = pneg %p507_p7 }
 0x100   : > { %p514_p0 = por %p513_p13, %p512_p12 }
 0x102   : > { %p515_p1 = pnand %p514_p0, %p508_p9 }
 0x104   : > { %518 = shalt.err (!%p515_p1)
}
 0x105   : > { %s574_s19 = smov 256   ;;  %s575_s21 = smov 16  }
 0x106   : > { %430 = dma.vmem_to_hbm [thread:$0]  (%p636_p4), %s670_s23, 512, %s675_s29, %s677_s15, %s574_s19, %s574_s19, %s575_s21  }
 0x107 PF: > { %p436_p2 = scmp.ge.s32.totalorder %s569_s17, 2  ;;  %s345_s26 = sand.u32 1, %s549_s12  }
 0x108   : > { %s346_s27 = scalar_lea.sflag [#allocation3], %s345_s26 }
 0x109   : > { %p433_p3 = pnand %p436_p2, %p643_p8 }
 0x10b   : > { %544 = dma.done.wait (!%p433_p3), %s346_s27, 512  }
 0x10c   : > { %546 = vsyncadd (!%p433_p3), %s346_s27, 4294966784  ;;  %s16_s17 = sadd.s32 1, %s569_s17   ;;  %s729_s12 = smov %s553_s13 }
 0x10d   : > { %p13_p5 = scmp.ge.s32.totalorder %s16_s17, 4   ;;  %s730_s13 = smov %s557_s14 }
 0x10e   : > { %s731_s14 = smov %s649_s25  ;;  %s732_s15 = smov %s565_s16 }
 0x10f   : > { %s733_s16 = smov %s735_s20  ;;  %15 = sbr.rel (!%p13_p5) target bundleno = 4 (0x4), region = 67 }
 0x116   :  { %351 = vsyncpa [#allocation3], 1 }
 0x117   :  { %353 = vsyncpa [#allocation3 + $0x1], 1 }

</bundles_post_ra>
